<compile_context>
chip_gen: v5e
topology: v5e:2x2
jax: 0.10.0
libtpu: 0.0.40
codegen_flags: <defaults>
</compile_context>

<pallas_src>
import math
from functools import partial

import jax
import jax.numpy as jnp
from jax import lax
from jax.experimental import pallas as pl
from jax.experimental.pallas import tpu as pltpu

_LN_EPS = 1e-5                    # nn.LayerNorm default
_INV_SQRT2 = 1.0 / math.sqrt(2.0)


def _evalhead_kernel(x_ref, g_ref, bta_ref, w1_ref, b1_ref, w2_ref, b2_ref, o_ref,
                     *, approximate_gelu):
    # x_ref: (TB, E) contiguous value tokens for this batch tile.
    x = x_ref[...].astype(jnp.float32)

    # --- LayerNorm over the embedding dim (stats in f32) ---
    mean = jnp.mean(x, axis=-1, keepdims=True)
    centered = x - mean
    var = jnp.mean(centered * centered, axis=-1, keepdims=True)
    xn = centered * lax.rsqrt(var + _LN_EPS)
    xn = xn * g_ref[...] + bta_ref[...]            # gamma/beta broadcast from (1, E)

    # --- Linear(E -> H) on the MXU: bf16 inputs, f32 accumulation ---
    h = jnp.dot(xn.astype(jnp.bfloat16), w1_ref[...],
                preferred_element_type=jnp.float32) + b1_ref[...]

    # --- GELU ---
    if approximate_gelu:
        # tanh form: transcendental rides the otherwise-idle EUP slot (review #4).
        h = jax.nn.gelu(h, approximate=True)
    else:
        # exact erf form, matching nn.GELU() default semantics.
        h = 0.5 * h * (1.0 + lax.erf(h * _INV_SQRT2))

    # --- Linear(H -> 1) as VPU broadcast-mul + lane reduction + bias ---
    # (an N=1 MXU matmul would waste the whole result FIFO)
    out = jnp.sum(h * w2_ref[...], axis=-1, keepdims=True) + b2_ref[...]

    # --- Sigmoid ---
    o_ref[...] = jax.nn.sigmoid(out).astype(o_ref.dtype)


def _round_up(n, m):
    return ((n + m - 1) // m) * m


def _batch_tile(B):
    """Pick the batch tile TB (multiple of 8 sublanes).

    Big enough to amortize the ~0.35 us per-grid-step overhead, small enough to keep
    the double-buffered VMEM footprint a few MiB, and whenever B > 8 chosen so the
    grid has an even number of >=2 tiles so a v7x megacore can split the "parallel"
    batch axis across both TensorCores (review #2, #3).
    """
    TB_MAX = 2048                      # ~4 MiB in+out double-buffered at f32
    if B <= 8:
        return 8                       # cannot split below one sublane group
    n_tiles = max(2, pl.cdiv(B, TB_MAX))
    if n_tiles % 2:
        n_tiles += 1                   # even tile count -> balanced across 2 TCs
    return _round_up(pl.cdiv(B, n_tiles), 8)


@partial(jax.jit, static_argnames=("approximate_gelu",))
def eval_head_forward(x, gamma, beta, w1, b1, w2, b2, approximate_gelu=False):
    """x: (B, S, E) float32.  Returns sigmoid eval in (B, 1) float32.

    Weights are stored as (in_features, out_features), i.e. the transpose of
    PyTorch's nn.Linear.weight layout, so the kernel computes x @ W directly.
    """
    B, S, E = x.shape
    H = w1.shape[1]

    # Review #1: slice the value token in the wrapper so the pallas_call input is a
    # contiguous (B, E) array -> each (TB, E) tile is one contiguous HBM read.
    vt = x[:, 0, :]

    TB = _batch_tile(B)
    grid = (pl.cdiv(B, TB),)

    # Small resident parameters: 2-D shapes so they map onto (sublane, lane);
    # constant index_maps keep them VMEM-resident (never re-fetched) across steps.
    gamma2 = gamma.reshape(1, E)
    beta2 = beta.reshape(1, E)
    w1_bf16 = w1.astype(jnp.bfloat16)              # MXU-native dtype
    b1_2 = b1.reshape(1, H)
    w2_row = w2.reshape(1, H).astype(jnp.float32)  # (H, 1) -> (1, H) row for VPU reduce
    b2_2 = b2.reshape(1, 1)

    def const(shape):
        return pl.BlockSpec(shape, lambda i: (0, 0))

    out = pl.pallas_call(
        partial(_evalhead_kernel, approximate_gelu=approximate_gelu),
        out_shape=jax.ShapeDtypeStruct((B, 1), jnp.float32),
        grid=grid,
        in_specs=[
            pl.BlockSpec((TB, E), lambda i: (i, 0)),   # contiguous value tokens
            const((1, E)),      # layernorm gamma
            const((1, E)),      # layernorm beta
            const((E, H)),      # linear1 weight (bf16, already (in, out))
            const((1, H)),      # linear1 bias
            const((1, H)),      # linear2 weight as a row
            const((1, 1)),      # linear2 bias
        ],
        out_specs=pl.BlockSpec((TB, 1), lambda i: (i, 0)),
        compiler_params=pltpu.CompilerParams(
            dimension_semantics=("parallel",),         # shard batch tiles across TCs
            vmem_limit_bytes=16 * 1024 * 1024,         # review #8: modest, ample headroom
        ),
    )(vt, gamma2, beta2, w1_bf16, b1_2, w2_row, b2_2)
    return out


if __name__ == "__main__":
    # Small config consistent with the module: embed_dim=32, eval_hidden_dim=128.
    B, S, E, H = 2, 8, 32, 128

    key = jax.random.PRNGKey(0)
    k_x, k_g, k_b, k_w1, k_b1, k_w2, k_b2 = jax.random.split(key, 7)

    x = jax.random.normal(k_x, (B, S, E), dtype=jnp.float32)

    # Deterministic synthetic parameters (not loaded from a checkpoint).
    gamma = 1.0 + 0.1 * jax.random.normal(k_g, (E,), dtype=jnp.float32)
    beta = 0.05 * jax.random.normal(k_b, (E,), dtype=jnp.float32)
    # Stored as (in_features, out_features) — transpose of nn.Linear.weight.
    w1 = jax.random.normal(k_w1, (E, H), dtype=jnp.float32) / math.sqrt(E)
    b1 = 0.01 * jax.random.normal(k_b1, (H,), dtype=jnp.float32)
    w2 = jax.random.normal(k_w2, (H, 1), dtype=jnp.float32) / math.sqrt(H)
    b2 = 0.01 * jax.random.normal(k_b2, (1,), dtype=jnp.float32)

    out = eval_head_forward(x, gamma, beta, w1, b1, w2, b2)
    out = jax.block_until_ready(out)

    # Pure-JAX f32 reference (module semantics: exact-erf GELU).
    vt = x[:, 0, :]
    mu = jnp.mean(vt, axis=-1, keepdims=True)
    var = jnp.mean((vt - mu) ** 2, axis=-1, keepdims=True)
    xn = (vt - mu) / jnp.sqrt(var + 1e-5) * gamma + beta
    h = xn @ w1 + b1
    h = 0.5 * h * (1.0 + lax.erf(h / math.sqrt(2.0)))
    ref = jax.nn.sigmoid(h @ w2 + b2)

    assert out.shape == (B, 1), out.shape
    # Kernel uses bf16 MXU inputs (f32 accumulate) -> small tolerance vs f32 reference.
    assert jnp.allclose(out, ref, atol=1e-2, rtol=1e-2), (out, ref)
    print("KERNEL_OK")
</pallas_src>

<mosaic_0001>
module attributes {stable_mosaic.version = 11 : i64} {
  func.func @_evalhead_kernel(%arg0: i32, %arg1: memref<8x32xf32, #tpu.memory_space<vmem>>, %arg2: memref<1x32xf32, #tpu.memory_space<vmem>>, %arg3: memref<1x32xf32, #tpu.memory_space<vmem>>, %arg4: memref<32x128xbf16, #tpu.memory_space<vmem>>, %arg5: memref<1x128xf32, #tpu.memory_space<vmem>>, %arg6: memref<1x128xf32, #tpu.memory_space<vmem>>, %arg7: memref<1x1xf32, #tpu.memory_space<vmem>>, %arg8: memref<8x1xf32, #tpu.memory_space<vmem>>) attributes {dimension_semantics = [#tpu.dimension_semantics<parallel>], iteration_bounds = array<i64: 1>, scalar_prefetch = 0 : i64, scratch_operands = 0 : i64, tpu.core_type = #tpu.core_type<tc>, window_params = [{transform_indices = @transform_0, window_bounds = array<i64: 8, 32>}, {pipeline_mode = #tpu.pipeline_mode<synchronous>, transform_indices = @transform_1, window_bounds = array<i64: 1, 32>}, {pipeline_mode = #tpu.pipeline_mode<synchronous>, transform_indices = @transform_2, window_bounds = array<i64: 1, 32>}, {pipeline_mode = #tpu.pipeline_mode<synchronous>, transform_indices = @transform_3, window_bounds = array<i64: 32, 128>}, {pipeline_mode = #tpu.pipeline_mode<synchronous>, transform_indices = @transform_4, window_bounds = array<i64: 1, 128>}, {pipeline_mode = #tpu.pipeline_mode<synchronous>, transform_indices = @transform_5, window_bounds = array<i64: 1, 128>}, {pipeline_mode = #tpu.pipeline_mode<synchronous>, transform_indices = @transform_6, window_bounds = array<i64: 1, 1>}, {transform_indices = @transform_7, window_bounds = array<i64: 8, 1>}]} {
    %c0 = arith.constant 0 : index
    %c0_0 = arith.constant 0 : index
    %0 = vector.load %arg1[%c0, %c0_0] : memref<8x32xf32, #tpu.memory_space<vmem>>, vector<8x32xf32>
    %cst = arith.constant dense<0.000000e+00> : vector<8xf32>
    %1 = vector.multi_reduction <add>, %0, %cst [1] : vector<8x32xf32> to vector<8xf32>
    %2 = vector.shape_cast %1 : vector<8xf32> to vector<8x1xf32>
    %cst_1 = arith.constant 3.200000e+01 : f32
    %3 = vector.broadcast %cst_1 : f32 to vector<8x1xf32>
    %4 = arith.divf %2, %3 : vector<8x1xf32>
    %5 = vector.broadcast %4 : vector<8x1xf32> to vector<8x32xf32>
    %6 = arith.subf %0, %5 : vector<8x32xf32>
    %7 = arith.mulf %6, %6 : vector<8x32xf32>
    %cst_2 = arith.constant dense<0.000000e+00> : vector<8xf32>
    %8 = vector.multi_reduction <add>, %7, %cst_2 [1] : vector<8x32xf32> to vector<8xf32>
    %9 = vector.shape_cast %8 : vector<8xf32> to vector<8x1xf32>
    %cst_3 = arith.constant 3.200000e+01 : f32
    %10 = vector.broadcast %cst_3 : f32 to vector<8x1xf32>
    %11 = arith.divf %9, %10 : vector<8x1xf32>
    %cst_4 = arith.constant 9.99999974E-6 : f32
    %12 = vector.broadcast %cst_4 : f32 to vector<8x1xf32>
    %13 = arith.addf %11, %12 : vector<8x1xf32>
    %14 = math.rsqrt %13 : vector<8x1xf32>
    %15 = vector.broadcast %14 : vector<8x1xf32> to vector<8x32xf32>
    %16 = arith.mulf %6, %15 : vector<8x32xf32>
    %c0_5 = arith.constant 0 : index
    %c0_6 = arith.constant 0 : index
    %17 = vector.load %arg2[%c0_5, %c0_6] : memref<1x32xf32, #tpu.memory_space<vmem>>, vector<1x32xf32>
    %18 = vector.broadcast %17 : vector<1x32xf32> to vector<8x32xf32>
    %19 = arith.mulf %16, %18 : vector<8x32xf32>
    %c0_7 = arith.constant 0 : index
    %c0_8 = arith.constant 0 : index
    %20 = vector.load %arg3[%c0_7, %c0_8] : memref<1x32xf32, #tpu.memory_space<vmem>>, vector<1x32xf32>
    %21 = vector.broadcast %20 : vector<1x32xf32> to vector<8x32xf32>
    %22 = arith.addf %19, %21 : vector<8x32xf32>
    %23 = arith.truncf %22 : vector<8x32xf32> to vector<8x32xbf16>
    %c0_9 = arith.constant 0 : index
    %c0_10 = arith.constant 0 : index
    %24 = vector.load %arg4[%c0_9, %c0_10] : memref<32x128xbf16, #tpu.memory_space<vmem>>, vector<32x128xbf16>
    %cst_11 = arith.constant dense<0.000000e+00> : vector<8x128xf32>
    %25 = tpu.matmul %23, %24, %cst_11 {dimension_numbers = #tpu.dot_dimension_numbers<[1], [0], [0], [1], [0, 0, 1, 1], [], []>} : vector<8x32xbf16>, vector<32x128xbf16>, vector<8x128xf32> -> vector<8x128xf32>
    %c0_12 = arith.constant 0 : index
    %c0_13 = arith.constant 0 : index
    %26 = vector.load %arg5[%c0_12, %c0_13] : memref<1x128xf32, #tpu.memory_space<vmem>>, vector<1x128xf32>
    %27 = vector.broadcast %26 : vector<1x128xf32> to vector<8x128xf32>
    %28 = arith.addf %25, %27 : vector<8x128xf32>
    %cst_14 = arith.constant 5.000000e-01 : f32
    %29 = vector.broadcast %cst_14 : f32 to vector<8x128xf32>
    %30 = arith.mulf %29, %28 : vector<8x128xf32>
    %cst_15 = arith.constant 0.707106769 : f32
    %31 = vector.broadcast %cst_15 : f32 to vector<8x128xf32>
    %32 = arith.mulf %28, %31 : vector<8x128xf32>
    %33 = math.erf %32 : vector<8x128xf32>
    %cst_16 = arith.constant 1.000000e+00 : f32
    %34 = vector.broadcast %cst_16 : f32 to vector<8x128xf32>
    %35 = arith.addf %34, %33 : vector<8x128xf32>
    %36 = arith.mulf %30, %35 : vector<8x128xf32>
    %c0_17 = arith.constant 0 : index
    %c0_18 = arith.constant 0 : index
    %37 = vector.load %arg6[%c0_17, %c0_18] : memref<1x128xf32, #tpu.memory_space<vmem>>, vector<1x128xf32>
    %38 = vector.broadcast %37 : vector<1x128xf32> to vector<8x128xf32>
    %39 = arith.mulf %36, %38 : vector<8x128xf32>
    %cst_19 = arith.constant dense<0.000000e+00> : vector<8xf32>
    %40 = vector.multi_reduction <add>, %39, %cst_19 [1] : vector<8x128xf32> to vector<8xf32>
    %41 = vector.shape_cast %40 : vector<8xf32> to vector<8x1xf32>
    %c0_20 = arith.constant 0 : index
    %c0_21 = arith.constant 0 : index
    %42 = vector.load %arg7[%c0_20, %c0_21] : memref<1x1xf32, #tpu.memory_space<vmem>>, vector<1x1xf32>
    %43 = vector.broadcast %42 : vector<1x1xf32> to vector<8x1xf32>
    %44 = arith.addf %41, %43 : vector<8x1xf32>
    %45 = arith.negf %44 : vector<8x1xf32>
    %46 = math.exp %45 : vector<8x1xf32>
    %cst_22 = arith.constant 1.000000e+00 : f32
    %47 = vector.broadcast %cst_22 : f32 to vector<8x1xf32>
    %48 = arith.addf %47, %46 : vector<8x1xf32>
    %49 = arith.divf %47, %48 : vector<8x1xf32>
    %c0_23 = arith.constant 0 : index
    %c0_24 = arith.constant 0 : index
    %50 = vector.load %arg8[%c0_23, %c0_24] : memref<8x1xf32, #tpu.memory_space<vmem>>, vector<8x1xf32>
    tpu.vector_store %arg8[%c0_23, %c0_24], %49 {strides = array<i32>} : memref<8x1xf32, #tpu.memory_space<vmem>>, vector<8x1xf32>,
    return
  }
  func.func @transform_0(%arg0: i32) -> (i32, i32) {
    %c0_i32 = arith.constant 0 : i32
    %c0_i32_0 = arith.constant 0 : i32
    return %arg0, %c0_i32 : i32, i32
  }
  func.func @transform_1(%arg0: i32) -> (i32, i32) {
    %c0_i32 = arith.constant 0 : i32
    %c0_i32_0 = arith.constant 0 : i32
    %c0_i32_1 = arith.constant 0 : i32
    return %c0_i32, %c0_i32_0 : i32, i32
  }
  func.func @transform_2(%arg0: i32) -> (i32, i32) {
    %c0_i32 = arith.constant 0 : i32
    %c0_i32_0 = arith.constant 0 : i32
    %c0_i32_1 = arith.constant 0 : i32
    return %c0_i32, %c0_i32_0 : i32, i32
  }
  func.func @transform_3(%arg0: i32) -> (i32, i32) {
    %c0_i32 = arith.constant 0 : i32
    %c0_i32_0 = arith.constant 0 : i32
    %c0_i32_1 = arith.constant 0 : i32
    return %c0_i32, %c0_i32_0 : i32, i32
  }
  func.func @transform_4(%arg0: i32) -> (i32, i32) {
    %c0_i32 = arith.constant 0 : i32
    %c0_i32_0 = arith.constant 0 : i32
    %c0_i32_1 = arith.constant 0 : i32
    return %c0_i32, %c0_i32_0 : i32, i32
  }
  func.func @transform_5(%arg0: i32) -> (i32, i32) {
    %c0_i32 = arith.constant 0 : i32
    %c0_i32_0 = arith.constant 0 : i32
    %c0_i32_1 = arith.constant 0 : i32
    return %c0_i32, %c0_i32_0 : i32, i32
  }
  func.func @transform_6(%arg0: i32) -> (i32, i32) {
    %c0_i32 = arith.constant 0 : i32
    %c0_i32_0 = arith.constant 0 : i32
    %c0_i32_1 = arith.constant 0 : i32
    return %c0_i32, %c0_i32_0 : i32, i32
  }
  func.func @transform_7(%arg0: i32) -> (i32, i32) {
    %c0_i32 = arith.constant 0 : i32
    %c0_i32_0 = arith.constant 0 : i32
    return %arg0, %c0_i32 : i32, i32
  }
}

</mosaic_0001>

<bundles_post_ra>
// kernel: eval_head_forward.1
= control target key start
LH: loop header
LB: loop body
LE: loop exit
PB: predicated region body
PF: predicated region fallthrough
CT: control target
= control target key end

     0   :  { %s325_s0 = inlined_call_operand.vmem [shape: f32[2,32], index: 0, kind: input, shape index: {}]   ;;  %s326_s1 = inlined_call_operand.vmem [shape: f32[1,32], index: 1, kind: input, shape index: {}]   ;;  %s327_s2 = inlined_call_operand.vmem [shape: f32[1,32], index: 2, kind: input, shape index: {}]   ;;  %s328_s3 = inlined_call_operand.vmem [shape: bf16[32,128], index: 3, kind: input, shape index: {}]   ;;  %s329_s4 = inlined_call_operand.vmem [shape: f32[1,128], index: 4, kind: input, shape index: {}]   ;;  %s330_s5 = inlined_call_operand.vmem [shape: f32[1,128], index: 5, kind: input, shape index: {}]   ;;  %s331_s6 = inlined_call_operand.<no memory space> [shape: f32[1,1], index: 6, kind: input, shape index: {}]   ;;  %s332_s7 = inlined_call_operand.vmem [shape: f32[2,1], index: 7, kind: output, shape index: {}]  }
   0x1   :  { %v12_v0 = vstv %s331_s6 }
   0x2   :  { %13 = vst [vmem:[#allocation2] sm:$0x1] %v12_v0 }
   0x3   :  { %v29_v1 = vld [vmem:[%s325_s0] sm:$0xff]  ;;  %vm30_vm0 = vcmask 261120   ;;  %v254_v3 = vmov 32.0   ;;  %v237_v15 = vld [vmem:[%s328_s3 + $0x8] sm:$0xff]  ;;  %vm182_vm11 = vcmask 7168  }
   0x4   :  { %v31_v2 = vsel %vm30_vm0, %v29_v1, 0.0  ;;  %244 = vrcp.f32 %v254_v3  ;;  %100 = vmatpush.bf16.msra.mxu0 %v237_v15  ;;  %v236_v16 = vld [vmem:[%s328_s3] sm:$0xff] }
   0x5   :  { %32 = vadd.xlane.f32.xlu0 %v31_v2  ;;  %v239_v26 = vld [vmem:[%s326_s1] ss:$0 sm:$0xff] }
   0x6   :  { %v240_v29 = vld [vmem:[%s327_s2] ss:$0 sm:$0xff] }
   0x7   :  { %v241_v33 = vld [vmem:[%s329_s4] ss:$0 sm:$0xff] }
   0x8   :  { %101 = vmatpush.bf16.msra.mxu0 %v236_v16 }
   0xa   :  { %v245_v4 = vpop.eup %244 }
   0xb   :  { %v35_v5 = vmul.f32 32.0, %v245_v4  ;;  %vm39_vm1 = vweird.f32 %v245_v4 }
   0xd   :  { %v36_v6 = vsub.f32 1.0, %v35_v5 }
   0xf   :  { %v37_v7 = vmul.f32 %v245_v4, %v36_v6 }
  0x11   :  { %v38_v8 = vadd.f32 %v245_v4, %v37_v7 }
  0x13   :  { %v40_v9 = vsel %vm39_vm1, %v245_v4, %v38_v8 }
  0x78   :  { %v33_v10 = vpop.xlane.xlu0 %32 }
  0x79   :  { %v41_v11 = vmul.f32 %v40_v9, %v33_v10 }
  0x7b   :  { %v42_v12 = vsub.f32 %v29_v1, %v41_v11  ;;  %v242_v11 = vld [vmem:[%s330_s5] ss:$0 sm:$0xff] }
  0x7d   :  { %v43_v13 = vmul.f32 %v42_v12, %v42_v12 }
  0x7f   :  { %v44_v14 = vsel %vm30_vm0, %v43_v13, 0.0 }
  0x80   :  { %45 = vadd.xlane.f32.xlu0 %v44_v14  ;;  %v243_v14 = vld [vmem:[#allocation2] ss:$0 sm:$0xff] }
  0xf3   :  { %v46_v17 = vpop.xlane.xlu0 %45 }
  0xf4   :  { %v47_v18 = vmul.f32 %v46_v17, %v40_v9 }
  0xf6   :  { %v48_v19 = vadd.f32 1e-05, %v47_v18 }
  0xf8   :  { %246 = vrsqrt.f32 %v48_v19  ;;  %vm55_vm3 = vweird.f32 %v48_v19 }
  0xfe   :  { %v247_v20 = vpop.eup %246 }
  0xff   :  { %v50_v21 = vmul.f32 %v247_v20, %v48_v19  ;;  %vm56_vm2 = vweird.f32 %v247_v20 }
 0x100   :  { %vm57_vm4 = vmor %vm55_vm3, %vm56_vm2 }
 0x101   :  { %v51_v22 = vmul.f32 %v247_v20, %v50_v21 }
 0x103   :  { %v52_v23 = vmul.f32 0.5, %v51_v22 }
 0x105   :  { %v53_v24 = vsub.f32 1.5, %v52_v23 }
 0x107   :  { %v54_v25 = vmul.f32 %v247_v20, %v53_v24 }
 0x109   :  { %v58_v27 = vsel %vm57_vm4, %v247_v20, %v54_v25 }
 0x10a   :  { %v59_v28 = vmul.f32 %v58_v27, %v42_v12 }
 0x10c   :  { %v64_v30 = vmul.f32 %v239_v26, %v59_v28 }
 0x10e   :  { %v69_v31 = vadd.f32 %v240_v29, %v64_v30 }
 0x110   :  { %v70_v32 = vpack.c.bf16 %v69_v31, %v69_v31 }
 0x112   :  { %233 = vmatmul.msk.bf16.vlgmr.msra.gmra.mxu0 %vm30_vm0, %v70_v32 }
 0x18f   :  { %v103_v34 = vpop.f32.mrf.mxu0 }
 0x190   :  { %v104_v35 = vadd.f32 %v241_v33, %v103_v34 }
 0x192   :  { %v108_v36 = vmul.f32 0.70710677, %v104_v35  ;;  %v107_v9 = vmul.f32 0.5, %v104_v35 }
 0x194   :  { %v109_v37 = vmul.f32 %v108_v36, %v108_v36 }
 0x196   :  { %v110_v38 = vmin.f32 %v109_v37, 16.0 }
 0x197   :  { %v105_v39 = vpop.f32.mrf.mxu0 }
 0x198   :  { %v111_v40 = vmul.f32 2.1237322e-06, %v110_v38  ;;  %v122_v41 = vmul.f32 3.8918573e-05, %v110_v38 }
 0x19a   :  { %v112_v42 = vadd.f32 0.00028619796, %v111_v40  ;;  %v123_v43 = vadd.f32 0.001143296, %v122_v41 }
 0x19c   :  { %v113_v44 = vmul.f32 %v112_v42, %v110_v38  ;;  %v124_v45 = vmul.f32 %v123_v43, %v110_v38 }
 0x19e   :  { %v125_v46 = vadd.f32 0.014752088, %v124_v45  ;;  %v114_v47 = vadd.f32 0.0036580483, %v113_v44 }
 0x1a0   :  { %v126_v48 = vmul.f32 %v125_v46, %v110_v38  ;;  %v115_v50 = vmul.f32 %v114_v47, %v110_v38 }
 0x1a2   :  { %v127_v49 = vadd.f32 0.112945676, %v126_v48  ;;  %v116_v53 = vadd.f32 0.05243302, %v115_v50 }
 0x1a4   :  { %v128_v51 = vmul.f32 %v127_v49, %v110_v38  ;;  %v117_v56 = vmul.f32 %v116_v53, %v110_v38 }
 0x1a6   :  { %v129_v52 = vadd.f32 0.4994258, %v128_v51  ;;  %v118_v57 = vadd.f32 0.18741608, %v117_v56 }
 0x1a8   :  { %v130_v54 = vmul.f32 %v129_v52, %v110_v38  ;;  %v119_v59 = vmul.f32 %v118_v57, %v110_v38 }
 0x1aa   :  { %v131_v55 = vadd.f32 1.0, %v130_v54  ;;  %v120_v63 = vadd.f32 1.1283791, %v119_v59 }
 0x1ac   :  { %248 = vrcp.f32 %v131_v55  ;;  %v143_v62 = vand.u32 2147483648, %v131_v55  ;;  %v141_v1 = vand.u32 2147483647, %v131_v55  ;;  %vm137_vm6 = vweird.f32 %v131_v55 }
 0x1ad   :  { %v121_v4 = vmul.f32 %v120_v63, %v108_v36 }
 0x1ae   :  { %v144_v3 = vor.u32 1.1754944e-38, %v143_v62  ;;  %vm142_vm8 = vcmp.eq.f32.partialorder %v141_v1, 8.507059e+37 }
 0x1b2   :  { %v249_v58 = vpop.eup %248 }
 0x1b3   :  { %v133_v60 = vmul.f32 %v249_v58, %v131_v55  ;;  %vm138_vm5 = vweird.f32 %v249_v58 }
 0x1b4   :  { %vm139_vm7 = vmor %vm137_vm6, %vm138_vm5 }
 0x1b5   :  { %v134_v61 = vsub.f32 1.0, %v133_v60 }
 0x1b7   :  { %v135_v0 = vmul.f32 %v249_v58, %v134_v61 }
 0x1b9   :  { %v136_v2 = vadd.f32 %v249_v58, %v135_v0 }
 0x1bb   :  { %v140_v5 = vsel %vm139_vm7, %v249_v58, %v136_v2 }
 0x1bc   :  { %v145_v6 = vsel %vm142_vm8, %v144_v3, %v140_v5 }
 0x1bd   :  { %v146_v7 = vmul.f32 %v145_v6, %v121_v4 }
 0x1bf   :  { %v234_v8 = vclamps-f32 %v146_v7, 1.0 }
 0x1c1   :  { %v149_v10 = vadd.f32 1.0, %v234_v8 }
 0x1c3   :  { %v150_v12 = vmul.f32 %v149_v10, %v107_v9 }
 0x1c5   :  { %v155_v13 = vmul.f32 %v242_v11, %v150_v12 }
 0x1c7   :  { %156 = vadd.xlane.f32.xlu1 %v155_v13 }
 0x23a   :  { %v157_v15 = vpop.xlane.xlu1 %156 }
 0x23b   :  { %v162_v16 = vadd.f32 %v243_v14, %v157_v15 }
 0x23d   :  { %v235_v17 = vmul.f32 -1.442695, %v162_v16 }
 0x23f   :  { %250 = vpow2.f32 %v235_v17 }
 0x245   :  { %v251_v18 = vpop.eup %250 }
 0x246   :  { %v166_v19 = vadd.f32 1.0, %v251_v18 }
 0x248   :  { %252 = vrcp.f32 %v166_v19  ;;  %v178_v23 = vand.u32 2147483648, %v166_v19  ;;  %v176_v25 = vand.u32 2147483647, %v166_v19  ;;  %vm172_vm10 = vweird.f32 %v166_v19 }
 0x24a   :  { %v179_v27 = vor.u32 1.1754944e-38, %v178_v23  ;;  %vm177_vm13 = vcmp.eq.f32.partialorder %v176_v25, 8.507059e+37 }
 0x24e   :  { %v253_v20 = vpop.eup %252 }
 0x24f   :  { %v168_v21 = vmul.f32 %v253_v20, %v166_v19  ;;  %vm173_vm9 = vweird.f32 %v253_v20 }
 0x250   :  { %vm174_vm12 = vmor %vm172_vm10, %vm173_vm9 }
 0x251   :  { %v169_v22 = vsub.f32 1.0, %v168_v21 }
 0x253   :  { %v170_v24 = vmul.f32 %v253_v20, %v169_v22 }
 0x255   :  { %v171_v26 = vadd.f32 %v253_v20, %v170_v24 }
 0x257   :  { %v175_v28 = vsel %vm174_vm12, %v253_v20, %v171_v26 }
 0x258   :  { %v180_v29 = vsel %vm177_vm13, %v179_v27, %v175_v28 }
 0x259   :  { %183 = vst.msk [vmem:[#allocation3] sm:$0xff] %vm182_vm11, %v180_v29 }
 0x260   :  { %v202_v30 = vld [vmem:[#allocation3] sm:$0x3] }
 0x261   :  { %203 = vst [vmem:[%s332_s7] sm:$0x3] %v202_v30 }

</bundles_post_ra>
